<compile_context>
chip_gen: v6e
topology: v6e:2x2x1
jax: 0.10.0
libtpu: 0.0.40
codegen_flags: <defaults>
</compile_context>

<pallas_src>
import jax
import jax.numpy as jnp
from jax.experimental import pallas as pl
from jax.experimental.pallas import tpu as pltpu


_TARGET_BLOCK_BYTES = 2 << 20        # ~2 MiB per main buffer
_MIN_PALLAS_ELEMS = 1 << 18          # 256K elems: below this, XLA fusion wins
_VMEM_LIMIT_BYTES = 32 << 20         # safe on v5e/v6e/v7x; covers 4 x 2 x 2 MiB


def _round_up(x, m):
    return (x + m - 1) // m * m


def _coord_loss_kernel(out_ref, gt_ref, valid_ref, loss_ref):
    """loss = |out - gt| * valid  (no 3D gating).  Casts happen in-kernel."""
    dtype = loss_ref.dtype
    diff = jnp.abs(out_ref[...].astype(dtype) - gt_ref[...].astype(dtype))
    loss_ref[...] = diff * valid_ref[...].astype(dtype)


def _make_is3d_kernel(C):
    """loss = |out - gt| * valid * gate; gate = 1 for x/y channels, is_3D[b] for z.

    Block shapes:
      out/gt/valid : (tile_b, J*C)
      is_3D        : (tile_b, 1)   per-batch scalar column (native dtype)
    The z-channel mask is generated in-kernel (iota % C >= 2) -> no HBM stream.
    """

    def kernel(out_ref, gt_ref, valid_ref, is3d_ref, loss_ref):
        dtype = loss_ref.dtype
        diff = jnp.abs(out_ref[...].astype(dtype) - gt_ref[...].astype(dtype))
        diff = diff * valid_ref[...].astype(dtype)
        # Channel index along the flattened (J*C) lane axis.
        ch = jax.lax.broadcasted_iota(jnp.int32, diff.shape, dimension=1) % C
        gate = jnp.where(
            ch >= 2,
            is3d_ref[...].astype(dtype),          # (tile_b, 1) broadcasts over lanes
            jnp.ones((), dtype=dtype),
        )
        loss_ref[...] = diff * gate

    return kernel


def coord_loss(coord_out, coord_gt, valid, is_3D=None, *,
               min_pallas_elems=_MIN_PALLAS_ELEMS):
    """Pallas implementation of CoordLoss.forward.

    coord_out, coord_gt, valid : (B, J, C) arrays.
    is_3D                      : optional (B,) array; None means no z gating.
    Returns (B, J, C) loss in coord_out's dtype.
    """
    B, J, C = coord_out.shape
    dtype = coord_out.dtype

    # Small problems: let XLA fuse a few elementwise ops (already at HBM roofline).
    if B * J * C < min_pallas_elems:
        loss = (jnp.abs(coord_out.astype(dtype) - coord_gt.astype(dtype))
                * valid.astype(dtype))
        if is_3D is not None:
            gate = jnp.where(
                jnp.arange(C) >= 2,
                is_3D.astype(dtype)[:, None, None],
                jnp.ones((), dtype),
            )
            loss = loss * gate
        return loss

    JC = J * C
    itemsize = jnp.dtype(dtype).itemsize

    # Rows per block so one main buffer is ~2 MiB (multiple of 8 sublanes) ...
    rows_for_target = max(8, (_TARGET_BLOCK_BYTES // max(JC * itemsize, 1)) // 8 * 8)
    # ... but also split B into >= ~4 grid steps so v7x's two TensorCores are used
    # and the DMA/compute pipeline has depth.
    rows_for_split = _round_up(pl.cdiv(B, 4), 8)
    tile_b = max(8, min(rows_for_target, rows_for_split))
    grid = (pl.cdiv(B, tile_b),)          # ragged last block handled by Pallas

    # Free reshapes (contiguous views), no padding, no dtype casts.
    out2d = coord_out.reshape(B, JC)
    gt2d = coord_gt.reshape(B, JC)
    valid2d = valid.reshape(B, JC)

    main_spec = pl.BlockSpec((tile_b, JC), lambda i: (i, 0))
    cparams = pltpu.CompilerParams(
        dimension_semantics=("parallel",),
        vmem_limit_bytes=_VMEM_LIMIT_BYTES,
    )

    if is_3D is None:
        loss2d = pl.pallas_call(
            _coord_loss_kernel,
            out_shape=jax.ShapeDtypeStruct((B, JC), dtype),
            grid=grid,
            in_specs=[main_spec, main_spec, main_spec],
            out_specs=main_spec,
            compiler_params=cparams,
        )(out2d, gt2d, valid2d)
    else:
        is3d_col = is_3D.reshape(B, 1)    # native dtype, cast in-kernel
        loss2d = pl.pallas_call(
            _make_is3d_kernel(C),
            out_shape=jax.ShapeDtypeStruct((B, JC), dtype),
            grid=grid,
            in_specs=[
                main_spec,                                    # coord_out
                main_spec,                                    # coord_gt
                main_spec,                                    # valid
                pl.BlockSpec((tile_b, 1), lambda i: (i, 0)),  # is_3D column
            ],
            out_specs=main_spec,
            compiler_params=cparams,
        )(out2d, gt2d, valid2d, is3d_col)

    return loss2d.reshape(B, J, C)


def _reference(coord_out, coord_gt, valid, is_3D=None):
    loss = jnp.abs(coord_out - coord_gt) * valid
    if is_3D is not None:
        loss_z = loss[:, :, 2:] * is_3D[:, None, None].astype(loss.dtype)
        loss = jnp.concatenate((loss[:, :, :2], loss_z), axis=2)
    return loss


if __name__ == "__main__":
    key = jax.random.PRNGKey(0)
    k1, k2, k3, k4 = jax.random.split(key, 4)

    # --- Pallas path (forced); B=50 is NOT divisible by tile_b=16 -> exercises
    #     the ragged last block (OOB writes dropped, no wrapper pad/slice). ---
    B, J, C = 50, 40, 3
    coord_out = jax.random.normal(k1, (B, J, C), dtype=jnp.float32)
    coord_gt = jax.random.normal(k2, (B, J, C), dtype=jnp.float32)
    valid = (jax.random.uniform(k3, (B, J, C)) > 0.3).astype(jnp.float32)
    is_3D = (jax.random.uniform(k4, (B,)) > 0.5).astype(jnp.float32)

    loss = coord_loss(coord_out, coord_gt, valid, is_3D, min_pallas_elems=0)
    jax.block_until_ready(loss)
    assert loss.shape == (B, J, C)
    assert jnp.allclose(loss, _reference(coord_out, coord_gt, valid, is_3D),
                        atol=1e-6), "mismatch with is_3D (pallas path)"

    loss2 = coord_loss(coord_out, coord_gt, valid, None, min_pallas_elems=0)
    jax.block_until_ready(loss2)
    assert jnp.allclose(loss2, _reference(coord_out, coord_gt, valid, None),
                        atol=1e-6), "mismatch without is_3D (pallas path)"

    # --- Small-shape fallback path (default threshold -> plain jnp, no launch) ---
    Bs, Js, Cs = 2, 8, 3
    s1, s2, s3 = jax.random.split(jax.random.PRNGKey(1), 3)
    so = jax.random.normal(s1, (Bs, Js, Cs), dtype=jnp.float32)
    sg = jax.random.normal(s2, (Bs, Js, Cs), dtype=jnp.float32)
    sv = (jax.random.uniform(s3, (Bs, Js, Cs)) > 0.3).astype(jnp.float32)
    s3d = jnp.array([1.0, 0.0], dtype=jnp.float32)
    small = coord_loss(so, sg, sv, s3d)
    jax.block_until_ready(small)
    assert jnp.allclose(small, _reference(so, sg, sv, s3d), atol=1e-6), \
        "mismatch on small-shape fallback"

    print("KERNEL_OK")
</pallas_src>

<mosaic_0001>
module attributes {stable_mosaic.version = 11 : i64} {
  func.func @kernel(%arg0: i32, %arg1: memref<16x120xf32, #tpu.memory_space<vmem>>, %arg2: memref<16x120xf32, #tpu.memory_space<vmem>>, %arg3: memref<16x120xf32, #tpu.memory_space<vmem>>, %arg4: memref<16x1xf32, #tpu.memory_space<vmem>>, %arg5: memref<16x120xf32, #tpu.memory_space<vmem>>) attributes {dimension_semantics = [#tpu.dimension_semantics<parallel>], iteration_bounds = array<i64: 4>, scalar_prefetch = 0 : i64, scratch_operands = 0 : i64, tpu.core_type = #tpu.core_type<tc>, window_params = [{transform_indices = @transform_0, window_bounds = array<i64: 16, 120>}, {transform_indices = @transform_1, window_bounds = array<i64: 16, 120>}, {transform_indices = @transform_2, window_bounds = array<i64: 16, 120>}, {transform_indices = @transform_3, window_bounds = array<i64: 16, 1>}, {transform_indices = @transform_4, window_bounds = array<i64: 16, 120>}]} {
    %c0 = arith.constant 0 : index
    %c0_0 = arith.constant 0 : index
    %0 = vector.load %arg1[%c0, %c0_0] : memref<16x120xf32, #tpu.memory_space<vmem>>, vector<16x120xf32>
    %c0_1 = arith.constant 0 : index
    %c0_2 = arith.constant 0 : index
    %1 = vector.load %arg2[%c0_1, %c0_2] : memref<16x120xf32, #tpu.memory_space<vmem>>, vector<16x120xf32>
    %2 = arith.subf %0, %1 : vector<16x120xf32>
    %3 = math.absf %2 : vector<16x120xf32>
    %c0_3 = arith.constant 0 : index
    %c0_4 = arith.constant 0 : index
    %4 = vector.load %arg3[%c0_3, %c0_4] : memref<16x120xf32, #tpu.memory_space<vmem>>, vector<16x120xf32>
    %5 = arith.mulf %3, %4 : vector<16x120xf32>
    %6 = tpu.iota {dimensions = array<i32: 1>} : vector<16x120xi32>
    %c3_i32 = arith.constant 3 : i32
    %c0_i32 = arith.constant 0 : i32
    %7 = arith.cmpi eq, %c3_i32, %c0_i32 : i32
    %c1_i32 = arith.constant 1 : i32
    %8 = arith.select %7, %c1_i32, %c3_i32 : i32
    %9 = vector.broadcast %8 : i32 to vector<16x120xi32>
    %10 = arith.remsi %6, %9 : vector<16x120xi32>
    %c0_i32_5 = arith.constant 0 : i32
    %11 = vector.broadcast %c0_i32_5 : i32 to vector<16x120xi32>
    %12 = arith.cmpi ne, %10, %11 : vector<16x120xi32>
    %c0_i32_6 = arith.constant 0 : i32
    %13 = vector.broadcast %c0_i32_6 : i32 to vector<16x120xi32>
    %14 = arith.cmpi slt, %10, %13 : vector<16x120xi32>
    %c0_i32_7 = arith.constant 0 : i32
    %15 = arith.cmpi slt, %8, %c0_i32_7 : i32
    %16 = vector.broadcast %15 : i1 to vector<16x120xi1>
    %17 = vector.broadcast %16 : vector<16x120xi1> to vector<16x120xi1>
    %18 = arith.xori %14, %17 : vector<16x120xi1>
    %19 = arith.andi %18, %12 : vector<16x120xi1>
    %20 = vector.broadcast %8 : i32 to vector<16x120xi32>
    %21 = arith.addi %10, %20 : vector<16x120xi32>
    %22 = arith.select %19, %21, %10 : vector<16x120xi1>, vector<16x120xi32>
    %c2_i32 = arith.constant 2 : i32
    %23 = vector.broadcast %c2_i32 : i32 to vector<16x120xi32>
    %24 = arith.cmpi sge, %22, %23 : vector<16x120xi32>
    %c0_8 = arith.constant 0 : index
    %c0_9 = arith.constant 0 : index
    %25 = vector.load %arg4[%c0_8, %c0_9] : memref<16x1xf32, #tpu.memory_space<vmem>>, vector<16x1xf32>
    %cst = arith.constant 1.000000e+00 : f32
    %26 = vector.shape_cast %25 : vector<16x1xf32> to vector<16x1xf32>
    %27 = vector.broadcast %26 : vector<16x1xf32> to vector<16x120xf32>
    %28 = vector.broadcast %cst : f32 to vector<16x120xf32>
    %29 = arith.select %24, %27, %28 : vector<16x120xi1>, vector<16x120xf32>
    %30 = arith.mulf %5, %29 : vector<16x120xf32>
    %c0_10 = arith.constant 0 : index
    %c0_11 = arith.constant 0 : index
    %31 = vector.load %arg5[%c0_10, %c0_11] : memref<16x120xf32, #tpu.memory_space<vmem>>, vector<16x120xf32>
    tpu.vector_store %arg5[%c0_10, %c0_11], %30 {strides = array<i32>} : memref<16x120xf32, #tpu.memory_space<vmem>>, vector<16x120xf32>,
    return
  }
  func.func @transform_0(%arg0: i32) -> (i32, i32) {
    %c0_i32 = arith.constant 0 : i32
    %c0_i32_0 = arith.constant 0 : i32
    return %arg0, %c0_i32 : i32, i32
  }
  func.func @transform_1(%arg0: i32) -> (i32, i32) {
    %c0_i32 = arith.constant 0 : i32
    %c0_i32_0 = arith.constant 0 : i32
    return %arg0, %c0_i32 : i32, i32
  }
  func.func @transform_2(%arg0: i32) -> (i32, i32) {
    %c0_i32 = arith.constant 0 : i32
    %c0_i32_0 = arith.constant 0 : i32
    return %arg0, %c0_i32 : i32, i32
  }
  func.func @transform_3(%arg0: i32) -> (i32, i32) {
    %c0_i32 = arith.constant 0 : i32
    %c0_i32_0 = arith.constant 0 : i32
    return %arg0, %c0_i32 : i32, i32
  }
  func.func @transform_4(%arg0: i32) -> (i32, i32) {
    %c0_i32 = arith.constant 0 : i32
    %c0_i32_0 = arith.constant 0 : i32
    return %arg0, %c0_i32 : i32, i32
  }
}

</mosaic_0001>

<bundles_post_ra>
// kernel: tpu_custom_call.1
= control target key start
LH: loop header
LB: loop body
LE: loop exit
PB: predicated region body
PF: predicated region fallthrough
CT: control target
= control target key end

     0   :  { %9 = vsyncpa [#allocation3], 0  ;;  %s1048_s0 = inlined_call_operand.vmem [shape: f32[50,120], index: 0, kind: input, shape index: {}]   ;;  %s1049_s1 = inlined_call_operand.hbm [shape: f32[50,120], index: 1, kind: input, shape index: {}]   ;;  %s1050_s2 = inlined_call_operand.hbm [shape: f32[50,120], index: 2, kind: input, shape index: {}]   ;;  %s1051_s3 = inlined_call_operand.vmem [shape: f32[50,1], index: 3, kind: input, shape index: {}]   ;;  %s1052_s4 = inlined_call_operand.hbm [shape: f32[50,120], index: 4, kind: output, shape index: {}]  }
   0x1   :  { %11 = vsyncpa [#allocation3 + $0x1], 0 }
   0x2   :  { %12 = vsyncpa [#allocation6], 0 }
   0x3   :  { %14 = vsyncpa [#allocation6 + $0x1], 0 }
   0x4   :  { %15 = vsyncpa [#allocation4], 0 }
   0x5   :  { %17 = vsyncpa [#allocation4 + $0x1], 0  ;;  %s801_s15 = smov 0   ;;  %s803_s16 = smov 0  }
   0x6   :  { %s805_s17 = smov 0   ;;  %s807_s18 = smov 0  }
   0x7 LB: > { %s822_s19 = sadd.s32 4294967295, %s764_s18   ;;  %s557_s20 = sadd.s32 4294967294, %s764_s18   ;;  %s764_s18 = sphi %s807_s18, %s1062_s18   ;;  %s760_s17 = sphi %s805_s17, %s1061_s17   ;;  %s756_s16 = sphi %s803_s16, %s1060_s16   ;;  %s752_s15 = sphi %s801_s15, %s1059_s15  }
   0x8   : > { %s826_s21 = sadd.s32 1, %s764_s18   ;;  %s56_s22 = sadd.s32 1, %s760_s17 }
   0x9   : > { %s53_s23 = ssub.s32 %s764_s18, %s826_s21  ;;  %p63_p0 = scmp.ne.s32.totalorder %s760_s17, %s756_s16 }
   0xa   : > { %p54_p1 = scmp.eq.s32.totalorder %s53_s23, 0  ;;  %p64_p2 = scmp.eq.s32.totalorder %s764_s18, 0 }
   0xb   : > { %p69_p3 = scmp.ne.s32.totalorder %s756_s16, %s752_s15  ;;  %p70_p4 = scmp.eq.s32.totalorder %s822_s19, 0 }
   0xc   : > { %s838_s24 = scalar_select %p54_p1, %s760_s17, %s56_s22  }
   0xd   : > { %p840_p5 = por %p64_p2, %p63_p0  ;;  %p844_p6 = por %p70_p4, %p69_p3 }
   0xe   : > { %p145_p7 = scmp.eq.s32.totalorder %s822_s19, 3  ;;  %p151_p8 = scmp.eq.s32.totalorder %s557_s20, 3 }
   0xf   : > { %p559_p11 = scmp.ge.s32.totalorder %s764_s18, 4 }
  0x10   : > { %p849_p9 = por %p145_p7, %p63_p0  ;;  %p853_p10 = por %p151_p8, %p69_p3 }
  0x11   : > { %167 = sbr.rel (%p559_p11) target bundleno = 86 (0x56), region = 16 }
  0x12   : > { %s1055_s27 = scalar_select %p849_p9, 1, 0 }
  0x13   : > { %s1056_s28 = scalar_select %p853_p10, 1, 0 }
  0x16   : > { %187 = sbr.rel (!%p840_p5) target bundleno = 54 (0x36), region = 24  ;;  %s188_s29 = sand.u32 (%p840_p5), 1, %s760_s17  }
  0x17   : > { %s561_s30 = sshll.u32 (%p840_p5), %s764_s18, 1  ;;  %s560_s5 = sshll.u32 (%p840_p5), %s188_s29, 4 }
  0x18   : > { %s194_s6 = ssub.s32 (%p840_p5), 7, %s561_s30  ;;  %s865_s9 = scalar_lea.sflag (%p840_p5), [#allocation3], %s188_s29 }
  0x19   : > { %p195_p12 = scmp.lt.s32.totalorder (%p840_p5), %s194_s6, 2  ;;  %s192_s10 = scalar_lea.vmem (%p840_p5), [#allocation2], %s560_s5 }
  0x1b   : > { %s1064_s6 = smov (!%p195_p12, %s194_s6), 2 }
  0x1c   : > { %s862_s7 = sshll.u32 %s1064_s6, 7 }
  0x1d   : > { %s199_s8 = ssub.s32 256, %s862_s7 }
  0x1e   : > { %200 = vsyncadd %s865_s9, %s199_s8  ;;  %p563_p13 = scmp.ne.s32.totalorder %s862_s7, 0  ;;  %s591_s11 = sshll.u32 %s764_s18, 8 }
  0x1f   : > { %s873_s14 = scalar_lea.hbm %s1049_s1, %s591_s11  ;;  %s205_s20 = sshll.u32 %s192_s10, 4  ;;  %s875_s20 = int_to_ptr.vmem [resolvable:$true] %s205_s20 }
  0x20   : > { %s644_s22 = scalar_lea.hbm %s873_s14, %s862_s7  ;;  %s648_s30 = scalar_lea.hbm %s1049_s1, 896 }
  0x21   : > { %p645_p0 = scmp.ne.s32.totalorder %s873_s14, %s644_s22  ;;  %p649_p3 = scmp.lt.s32.totalorder %s873_s14, %s1049_s1 }
  0x22   : > { %p650_p4 = scmp.lt.s32.totalorder %s648_s30, %s644_s22 }
  0x23   : > { %p646_p1 = pnand %p645_p0, %p563_p13 }
  0x24   : > { %p651_p7 = por %p650_p4, %p649_p3 }
  0x25   : > { %p647_p2 = pneg %p646_p1 }
  0x27   : > { %p652_p8 = pnand %p651_p7, %p647_p2 }
  0x29   : > { %655 = shalt.err (!%p652_p8)
}
  0x2a   : > { %s656_s8 = scalar_lea.vmem %s875_s20, %s862_s7  ;;  %s766_s10 = smov [#allocation2]  }
  0x2b   : > { %p657_p11 = scmp.ne.s32.totalorder %s875_s20, %s656_s8  ;;  %s660_s11 = sshll.u32 %s766_s10, 4  ;;  %s661_s11 = int_to_ptr.vmem [resolvable:$false] %s660_s11 }
  0x2c   : > { %s662_s12 = scalar_lea.vmem %s661_s11, 512  ;;  %p663_p1 = scmp.lt.s32.totalorder %s875_s20, %s661_s11 }
  0x2d   : > { %p658_p12 = pnand %p657_p11, %p563_p13  ;;  %p664_p10 = scmp.lt.s32.totalorder %s662_s12, %s656_s8 }
  0x2f   : > { %p659_p0 = pneg %p658_p12  ;;  %p665_p9 = por %p664_p10, %p663_p1 }
  0x31   : > { %p666_p3 = pnand %p665_p9, %p659_p0 }
  0x33   : > { %669 = shalt.err (!%p666_p3)
}
  0x34   : > { %s767_s13 = smov 128   ;;  %s768_s22 = smov 8  }
  0x35   : > { %211 = dma.hbm_to_vmem [thread:$0]  (%p563_p13), %s873_s14, %s862_s7, %s875_s20, %s865_s9, %s767_s13, %s767_s13, %s768_s22  }
  0x36 PF: > { %214 = sbr.rel (!%p840_p5) target bundleno = 86 (0x56), region = 28  ;;  %s215_s23 = sand.u32 (%p840_p5), 1, %s760_s17  }
  0x37   : > { %s568_s29 = sshll.u32 (%p840_p5), %s764_s18, 1  ;;  %s567_s30 = sshll.u32 (%p840_p5), %s215_s23, 4 }
  0x38   : > { %s221_s5 = ssub.s32 (%p840_p5), 7, %s568_s29  ;;  %s908_s10 = scalar_lea.sflag (%p840_p5), [#allocation6], %s215_s23 }
  0x39   : > { %p222_p9 = scmp.lt.s32.totalorder (%p840_p5), %s221_s5, 2  ;;  %s219_s7 = scalar_lea.vmem (%p840_p5), [#allocation5], %s567_s30 }
  0x3b   : > { %s1066_s5 = smov (!%p222_p9, %s221_s5), 2 }
  0x3c   : > { %s905_s6 = sshll.u32 %s1066_s5, 7 }
  0x3d   : > { %s226_s8 = ssub.s32 256, %s905_s6 }
  0x3e   : > { %227 = vsyncadd %s908_s10, %s226_s8  ;;  %p570_p5 = scmp.ne.s32.totalorder %s905_s6, 0  ;;  %s592_s25 = sshll.u32 %s764_s18, 8 }
  0x3f   : > { %s916_s20 = scalar_lea.hbm %s1050_s2, %s592_s25  ;;  %s232_s11 = sshll.u32 %s219_s7, 4  ;;  %s918_s11 = int_to_ptr.vmem [resolvable:$true] %s232_s11 }
  0x40   : > { %s670_s12 = scalar_lea.hbm %s916_s20, %s905_s6  ;;  %s674_s23 = scalar_lea.hbm %s1050_s2, 896 }
  0x41   : > { %p671_p10 = scmp.ne.s32.totalorder %s916_s20, %s670_s12  ;;  %p675_p4 = scmp.lt.s32.totalorder %s916_s20, %s1050_s2 }
  0x42   : > { %p676_p7 = scmp.lt.s32.totalorder %s674_s23, %s670_s12 }
  0x43   : > { %p672_p13 = pnand %p671_p10, %p570_p5 }
  0x44   : > { %p677_p8 = por %p676_p7, %p675_p4 }
  0x45   : > { %p673_p2 = pneg %p672_p13 }
  0x47   : > { %p678_p11 = pnand %p677_p8, %p673_p2 }
  0x49   : > { %681 = shalt.err (!%p678_p11)
}
  0x4a   : > { %s682_s5 = scalar_lea.vmem %s918_s11, %s905_s6  ;;  %s769_s8 = smov [#allocation5]  }
  0x4b   : > { %p683_p12 = scmp.ne.s32.totalorder %s918_s11, %s682_s5  ;;  %s686_s7 = sshll.u32 %s769_s8, 4  ;;  %s687_s7 = int_to_ptr.vmem [resolvable:$false] %s686_s7 }
  0x4c   : > { %s688_s25 = scalar_lea.vmem %s687_s7, 512  ;;  %p689_p3 = scmp.lt.s32.totalorder %s918_s11, %s687_s7 }
  0x4d   : > { %p684_p0 = pnand %p683_p12, %p570_p5  ;;  %p690_p9 = scmp.lt.s32.totalorder %s688_s25, %s682_s5 }
  0x4f   : > { %p685_p1 = pneg %p684_p0  ;;  %p691_p10 = por %p690_p9, %p689_p3 }
  0x51   : > { %p692_p13 = pnand %p691_p10, %p685_p1 }
  0x53   : > { %695 = shalt.err (!%p692_p13)
}
  0x54   : > { %s770_s9 = smov 128   ;;  %s771_s14 = smov 8  }
  0x55   : > { %238 = dma.hbm_to_vmem [thread:$0]  (%p570_p5), %s916_s20, %s905_s6, %s918_s11, %s908_s10, %s770_s9, %s770_s9, %s771_s14  }
  0x56 PF: > { %p574_p2 = scmp.ge.s32.totalorder %s764_s18, 1  ;;  %p257_p4 = scmp.lt.s32.totalorder %s764_s18, 5 }
  0x58   : > { %p258_p7 = pnand %p574_p2, %p257_p4 }
  0x59   : > { %s947_s12 = sand.u32 (!%p258_p7), 1, %s756_s16  }
  0x5a   : > { %261 = sbr.rel (%p258_p7) target bundleno = 265 (0x109), region = 36  ;;  %s950_s13 = sshll.u32 (!%p258_p7), %s947_s12, 4 }
  0x5b   : > { %s264_s22 = scalar_lea.sflag (!%p258_p7), [#allocation3], %s947_s12  ;;  %s267_s23 = scalar_lea.vmem (!%p258_p7), [#allocation2], %s950_s13 }
  0x5f   : > { %739 = dma.done.wait (%p844_p6), %s264_s22, 256  }
  0x60   : > { %741 = vsyncadd (%p844_p6), %s264_s22, 4294967040  ;;  %s273_s6 = scalar_lea.sflag [#allocation6], %s947_s12  ;;  %s276_s10 = scalar_lea.vmem [#allocation5], %s950_s13 }
  0x61   : > { %743 = dma.done.wait (%p844_p6), %s273_s6, 256  }
  0x62   : > { %745 = vsyncadd (%p844_p6), %s273_s6, 4294967040  ;;  %s965_s20 = sshll.u32 %s822_s19, 1  ;;  %v772_v0 = vmov 0   ;;  %v379_v3 = vlaneseq  ;;  %v369_v11 = vld [vmem:[%s267_s23] sm:$0xff]  ;;  %v370_v14 = vld [vmem:[%s267_s23 + $0x8] sm:$0xff]  ;;  %vm414_vm4 = vcmask 982016  }
  0x63   : > { %643 = vset.pattern.permute.xlu0 %v772_v0  ;;  %p329_p5 = scmp.lt.s32.totalorder %s965_s20, 6  ;;  %v375_v19 = vld [vmem:[%s276_s10] sm:$0xff]  ;;  %v376_v22 = vld [vmem:[%s276_s10 + $0x8] sm:$0xff]  ;;  %s323_s9 = scalar_lea.vmem [#allocation7], %s950_s13 }
  0x64   : > { %v380_v4 = vand.u32 127, %v379_v3  ;;  %s418_s14 = scalar_lea.sflag [#allocation4], %s947_s12  ;;  %p1057_p6 = scmp.ne.s32.totalorder %s1055_s27, 0 }
  0x65   : > { %s330_s11 = scalar_select %p329_p5, %s965_s20, 6 }
  0x66   : > { %v972_v5 = vmul.u32.u64.low 2863311531, %v380_v4  ;;  %v973_v6 = vmul.u32.u64.high 2863311531, %v380_v4, %v972_v5  ;;  %s426_s22 = ssub.s32 (%p1057_p6), 7, %s965_s20 }
  0x67   : > { %s579_s29 = sshll.u32 %s330_s11, 3  ;;  %p427_p8 = scmp.lt.s32.totalorder (%p1057_p6), %s426_s22, 2 }
  0x68   : > { %s356_s8 = scalar_lea.vmem %s1051_s3, %s579_s29  ;;  %v387_v7 = vshrl.u32 %v973_v6, 1  ;;  %s332_s25 = scalar_lea.vmem %s1048_s0, %s579_s29 }
  0x69   : > { %v398_v1 = vld [vmem:[%s356_s8] sm:$0xff]  ;;  %v399_v2 = vld [vmem:[%s356_s8 + $0x8] sm:$0xff] }
  0x6a   : > { %402 = vperm.xlu0 %643, %v398_v1   ;;  %v388_v8 = vmul.u32 3, %v387_v7  ;;  %v367_v10 = vld [vmem:[%s332_s25] sm:$0xff]  ;;  %v368_v13 = vld [vmem:[%s332_s25 + $0x8] sm:$0xff] }
  0x6b   : > { %v371_v12 = vsub.f32 %v367_v10, %v369_v11  ;;  %v372_v16 = vsub.f32 %v368_v13, %v370_v14 }
  0x6c   : > { %v389_v9 = vsub.s32 %v380_v4, %v388_v8 }
  0x6d   : > { %v373_v17 = vand.u32 2147483647, %v371_v12  ;;  %v374_v21 = vand.u32 2147483647, %v372_v16 }
  0x6e   : > { %407 = vperm.xlu0 %643, %v399_v2   ;;  %vm392_vm0 = vcmp.ne.s32.totalorder %v389_v9, 0  ;;  %vm393_vm1 = vcmp.lt.s32.totalorder %v389_v9, 0  ;;  %v395_v15 = vadd.s32 3, %v389_v9 }
  0x6f   : > { %vm394_vm2 = vmand %vm393_vm1, %vm392_vm0  ;;  %v377_v20 = vmul.f32 %v375_v19, %v373_v17  ;;  %v378_v26 = vmul.f32 %v376_v22, %v374_v21 }
  0x70   : > { %v396_v18 = vsel %vm394_vm2, %v395_v15, %v389_v9 }
  0x71   : > { %vm397_vm3 = vcmp.ge.s32.totalorder %v396_v18, 2 }
  0xe5   : > { %v403_v23 = vpop.permute.xlu0 %402 }
  0xe6   : > { %v410_v24 = vsel %vm397_vm3, %v403_v23, 1.0 }
  0xe7   : > { %v412_v25 = vmul.f32 %v410_v24, %v377_v20 }
  0xe9   : > { %415 = vst.msk [vmem:[%s323_s9] sm:$0xff] %vm414_vm4, %v412_v25  ;;  %v408_v27 = vpop.permute.xlu0 %407  ;;  %424 = sbr.rel (!%p1057_p6) target bundleno = 265 (0x109), region = 48 }
  0xea   : > { %v411_v28 = vsel %vm397_vm3, %v408_v27, 1.0 }
  0xeb   : > { %v413_v29 = vmul.f32 %v411_v28, %v378_v26 }
  0xed   : > { %416 = vst.msk [vmem:[%s323_s9 + $0x8] sm:$0xff] %vm414_vm4, %v413_v29 }
  0xee   : > { %s1068_s22 = smov (!%p427_p8, %s426_s22), 2 }
  0xef   : > { %s992_s23 = sshll.u32 %s1068_s22, 7 }
  0xf0   : > { %s431_s6 = ssub.s32 256, %s992_s23 }
  0xf1   : > { %432 = vsyncadd %s418_s14, %s431_s6  ;;  %p585_p11 = scmp.ne.s32.totalorder %s992_s23, 0  ;;  %s593_s13 = sshll.u32 %s822_s19, 8 }
  0xf2   : > { %s1002_s11 = scalar_lea.hbm %s1052_s4, %s593_s13  ;;  %s437_s20 = sshll.u32 %s323_s9, 4  ;;  %s1004_s20 = int_to_ptr.vmem [resolvable:$true] %s437_s20 }
  0xf3   : > { %s696_s29 = scalar_lea.vmem %s1004_s20, %s992_s23  ;;  %s773_s30 = smov [#allocation7]  }
  0xf4   : > { %p697_p12 = scmp.ne.s32.totalorder %s1004_s20, %s696_s29  ;;  %s700_s5 = sshll.u32 %s773_s30, 4  ;;  %s701_s5 = int_to_ptr.vmem [resolvable:$false] %s700_s5 }
  0xf5   : > { %s702_s19 = scalar_lea.vmem %s701_s5, 512  ;;  %p703_p3 = scmp.lt.s32.totalorder %s1004_s20, %s701_s5 }
  0xf6   : > { %p698_p0 = pnand %p697_p12, %p585_p11  ;;  %p704_p9 = scmp.lt.s32.totalorder %s702_s19, %s696_s29 }
  0xf8   : > { %p699_p1 = pneg %p698_p0  ;;  %p705_p10 = por %p704_p9, %p703_p3 }
  0xfa   : > { %p706_p13 = pnand %p705_p10, %p699_p1 }
  0xfc   : > { %709 = shalt.err (!%p706_p13)
}
  0xfd   : > { %s710_s8 = scalar_lea.hbm %s1002_s11, %s992_s23  ;;  %s714_s25 = scalar_lea.hbm %s1052_s4, 896 }
  0xfe   : > { %p711_p2 = scmp.ne.s32.totalorder %s1002_s11, %s710_s8  ;;  %p715_p5 = scmp.lt.s32.totalorder %s1002_s11, %s1052_s4 }
  0xff   : > { %p716_p6 = scmp.lt.s32.totalorder %s714_s25, %s710_s8 }
 0x100   : > { %p712_p4 = pnand %p711_p2, %p585_p11 }
 0x101   : > { %p717_p8 = por %p716_p6, %p715_p5 }
 0x102   : > { %p713_p7 = pneg %p712_p4 }
 0x104   : > { %p718_p12 = pnand %p717_p8, %p713_p7 }
 0x106   : > { %721 = shalt.err (!%p718_p12)
}
 0x107   : > { %s774_s6 = smov 128   ;;  %s775_s13 = smov 8  }
 0x108   : > { %443 = dma.vmem_to_hbm [thread:$0]  (%p585_p11), %s1004_s20, %s992_s23, %s1002_s11, %s418_s14, %s774_s6, %s774_s6, %s775_s13  }
 0x109 PF: > { %p603_p0 = scmp.ge.s32.totalorder %s764_s18, 2  ;;  %s452_s10 = sand.u32 1, %s752_s15  }
 0x10a   : > { %p1058_p1 = scmp.ne.s32.totalorder %s1056_s28, 0  ;;  %s453_s27 = scalar_lea.sflag [#allocation4], %s452_s10 }
 0x10c   : > { %p600_p3 = pnand %p603_p0, %p1058_p1 }
 0x10e   : > { %p601_p9 = pneg %p600_p3 }
 0x110   : > { %747 = dma.done.wait (%p601_p9), %s453_s27, 256  }
 0x111   : > { %749 = vsyncadd (%p601_p9), %s453_s27, 4294967040  ;;  %p20_p10 = scmp.ge.s32.totalorder %s826_s21, 6   ;;  %s1059_s15 = smov %s756_s16 }
 0x112   : > { %s1060_s16 = smov %s760_s17  ;;  %s1061_s17 = smov %s838_s24 }
 0x113   : > { %s1062_s18 = smov %s826_s21  ;;  %22 = sbr.rel (!%p20_p10) target bundleno = 7 (0x7), region = 100 }
 0x118   :  { %458 = vsyncpa [#allocation3], 1 }
 0x119   :  { %460 = vsyncpa [#allocation3 + $0x1], 1 }
 0x11a   :  { %461 = vsyncpa [#allocation6], 1 }
 0x11b   :  { %463 = vsyncpa [#allocation6 + $0x1], 1 }
 0x11c   :  { %464 = vsyncpa [#allocation4], 1 }
 0x11d   :  { %466 = vsyncpa [#allocation4 + $0x1], 1 }

</bundles_post_ra>
